<compile_context>
chip_gen: v6e
topology: v6e:2x2x1
jax: 0.10.0
libtpu: 0.0.40
codegen_flags: <defaults>
</compile_context>

<pallas_src>
import functools
import math

import jax
import jax.numpy as jnp
from jax.experimental import pallas as pl
from jax.experimental.pallas import tpu as pltpu


def _slot_conv_kernel(x_ref, w1_ref, w2_ref, o_ref, *, kernel_size, seq_len):
    """One lane tile = several whole samples flattened along the lane axis."""
    x = x_ref[...]            # (C_in, T)
    w1 = w1_ref[...]          # (C_tmp, C_in)
    T = x.shape[1]
    K = kernel_size
    pad_l = (K - 1) // 2

    # --- Conv1d(basesize -> tmpsize, k=1) + ReLU: one lane-dense MXU matmul.
    h = jnp.dot(w1, x, preferred_element_type=jnp.float32)
    h = jnp.maximum(h, 0.0)                                   # (C_tmp, T)

    # Position of each lane within its own sample (tiles hold whole samples,
    # so the tile start is a multiple of seq_len and local iota mod L works).
    pos = jax.lax.broadcasted_iota(jnp.int32, (1, T), 1) % seq_len

    # --- Grouped 'same' conv, fused into K block-diagonal matmuls over
    #     rolled + boundary-masked views of h.
    acc = jnp.zeros((o_ref.shape[0], T), jnp.float32)
    for k in range(K):
        s = k - pad_l                       # shift in [-pad_l, pad_r], static
        if s == 0:
            hk = h
        else:
            src = pos + s
            valid = (src >= 0) & (src < seq_len)
            hk = jnp.where(valid, pltpu.roll(h, shift=(-s) % T, axis=1), 0.0)
        acc = acc + jnp.dot(w2_ref[k], hk, preferred_element_type=jnp.float32)

    o_ref[...] = acc.astype(o_ref.dtype)    # one full-width store per tile


def _pick_tile(n, length, target_lanes=1024):
    """Samples per grid tile: whole samples, 128-aligned lane width, and keep
    >=2 grid steps (for v7x megacore) when the batch allows it."""
    d0 = 128 // math.gcd(length, 128)       # min samples for 128-aligned lanes
    d = d0
    n_cover = d0 * (-(-n // d0))
    while (d + d0) * length <= target_lanes and (d + d0) * 2 <= n_cover:
        d += d0
    n_pad = d * (-(-n // d))
    return d, n_pad


def slot_conv_forward(x, w1, w2, *, kernel_size, groups):
    """x: (N, basesize, L) NCW.  w1: (tmpsize, basesize).  w2: (basesize, tmpsize//G, K)."""
    n, c_in, length = x.shape
    c_tmp = w1.shape[0]
    K = kernel_size
    G = groups
    assert c_in % G == 0 and c_tmp % G == 0
    cg_in = c_tmp // G
    cg_out = c_in // G

    # ---- wrapper-side layout plumbing (cheap XLA ops) ----------------------
    d, n_pad = _pick_tile(n, length)
    tile = d * length                                    # multiple of 128

    x2 = jnp.transpose(x, (1, 0, 2)).reshape(c_in, n * length)
    x2 = jnp.pad(x2, ((0, 0), (0, (n_pad - n) * length)))

    # Block-diagonal second-conv weights: (K, C_in, C_tmp), zeros off-group,
    # so the kernel only ever indexes the leading (k) dimension.
    w2_bd = jnp.zeros((K, c_in, c_tmp), w2.dtype)
    for g in range(G):
        blk = jnp.transpose(w2[g * cg_out:(g + 1) * cg_out], (2, 0, 1))
        w2_bd = w2_bd.at[:, g * cg_out:(g + 1) * cg_out,
                         g * cg_in:(g + 1) * cg_in].set(blk)

    kernel = functools.partial(_slot_conv_kernel,
                               kernel_size=K, seq_len=length)

    out2 = pl.pallas_call(
        kernel,
        out_shape=jax.ShapeDtypeStruct((c_in, n_pad * length), x.dtype),
        grid_spec=pl.GridSpec(
            grid=(n_pad // d,),
            in_specs=[
                pl.BlockSpec((c_in, tile), lambda b: (0, b)),
                pl.BlockSpec((c_tmp, c_in), lambda b: (0, 0)),
                pl.BlockSpec((K, c_in, c_tmp), lambda b: (0, 0, 0)),
            ],
            out_specs=pl.BlockSpec((c_in, tile), lambda b: (0, b)),
        ),
        compiler_params=pltpu.CompilerParams(
            dimension_semantics=("parallel",)),
    )(x2, w1, w2_bd)

    out = out2.reshape(c_in, n_pad, length)[:, :n]
    return jnp.transpose(out, (1, 0, 2))


def _reference(x, w1, w2, *, kernel_size, groups):
    """Pure-JAX reference (matches PyTorch eval-mode forward)."""
    h = jnp.maximum(jnp.einsum('tc,ncl->ntl', w1, x), 0.0)
    pad_l = (kernel_size - 1) // 2
    pad_r = (kernel_size - 1) - pad_l
    return jax.lax.conv_general_dilated(
        h, w2,
        window_strides=(1,),
        padding=((pad_l, pad_r),),
        dimension_numbers=('NCH', 'OIH', 'NCH'),
        feature_group_count=groups,
    ).astype(x.dtype)


if __name__ == "__main__":
    # Small shapes consistent with the module.
    batch = 2
    basesize = 8      # in/out channels
    tmpsize = 16      # hidden channels
    length = 16       # sequence length
    kernel_size = 3
    groups = 4        # basesize % groups == 0 and tmpsize % groups == 0

    key = jax.random.PRNGKey(0)
    kx, k1, k2 = jax.random.split(key, 3)

    x = jax.random.normal(kx, (batch, basesize, length), dtype=jnp.float32)
    # Conv1d(basesize, tmpsize, 1, bias=False): weight (tmpsize, basesize, 1) -> (tmpsize, basesize)
    w1 = jax.random.normal(k1, (tmpsize, basesize), dtype=jnp.float32) * 0.1
    # Conv1d(tmpsize, basesize, K, groups=G, bias=False): weight (basesize, tmpsize//G, K)
    w2 = jax.random.normal(k2, (basesize, tmpsize // groups, kernel_size),
                           dtype=jnp.float32) * 0.1

    out = slot_conv_forward(x, w1, w2, kernel_size=kernel_size, groups=groups)
    out = jax.block_until_ready(out)

    ref = _reference(x, w1, w2, kernel_size=kernel_size, groups=groups)
    assert out.shape == (batch, basesize, length)
    assert jnp.allclose(out, ref, atol=1e-5, rtol=1e-5), "mismatch vs reference"

    print("KERNEL_OK")
</pallas_src>

<mosaic_0001>
module attributes {stable_mosaic.version = 11 : i64} {
  func.func @_slot_conv_kernel(%arg0: i32, %arg1: memref<8x128xf32, #tpu.memory_space<vmem>>, %arg2: memref<16x8xf32, #tpu.memory_space<vmem>>, %arg3: memref<3x8x16xf32, #tpu.memory_space<vmem>>, %arg4: memref<8x128xf32, #tpu.memory_space<vmem>>) attributes {dimension_semantics = [#tpu.dimension_semantics<parallel>], iteration_bounds = array<i64: 1>, scalar_prefetch = 0 : i64, scratch_operands = 0 : i64, tpu.core_type = #tpu.core_type<tc>, window_params = [{transform_indices = @transform_0, window_bounds = array<i64: 8, 128>}, {pipeline_mode = #tpu.pipeline_mode<synchronous>, transform_indices = @transform_1, window_bounds = array<i64: 16, 8>}, {pipeline_mode = #tpu.pipeline_mode<synchronous>, transform_indices = @transform_2, window_bounds = array<i64: 3, 8, 16>}, {transform_indices = @transform_3, window_bounds = array<i64: 8, 128>}]} {
    %c0 = arith.constant 0 : index
    %c0_0 = arith.constant 0 : index
    %0 = vector.load %arg1[%c0, %c0_0] : memref<8x128xf32, #tpu.memory_space<vmem>>, vector<8x128xf32>
    %c0_1 = arith.constant 0 : index
    %c0_2 = arith.constant 0 : index
    %1 = vector.load %arg2[%c0_1, %c0_2] : memref<16x8xf32, #tpu.memory_space<vmem>>, vector<16x8xf32>
    %cst = arith.constant dense<0.000000e+00> : vector<16x128xf32>
    %2 = tpu.matmul %1, %0, %cst {dimension_numbers = #tpu.dot_dimension_numbers<[1], [0], [0], [1], [0, 0, 1, 1], [], []>} : vector<16x8xf32>, vector<8x128xf32>, vector<16x128xf32> -> vector<16x128xf32>
    %cst_3 = arith.constant 0.000000e+00 : f32
    %3 = vector.broadcast %cst_3 : f32 to vector<16x128xf32>
    %4 = arith.maximumf %2, %3 : vector<16x128xf32>
    %5 = tpu.iota {dimensions = array<i32: 1>} : vector<1x128xi32>
    %c16_i32 = arith.constant 16 : i32
    %c0_i32 = arith.constant 0 : i32
    %6 = arith.cmpi eq, %c16_i32, %c0_i32 : i32
    %c1_i32 = arith.constant 1 : i32
    %7 = arith.select %6, %c1_i32, %c16_i32 : i32
    %8 = vector.broadcast %7 : i32 to vector<1x128xi32>
    %9 = arith.remsi %5, %8 : vector<1x128xi32>
    %c0_i32_4 = arith.constant 0 : i32
    %10 = vector.broadcast %c0_i32_4 : i32 to vector<1x128xi32>
    %11 = arith.cmpi ne, %9, %10 : vector<1x128xi32>
    %c0_i32_5 = arith.constant 0 : i32
    %12 = vector.broadcast %c0_i32_5 : i32 to vector<1x128xi32>
    %13 = arith.cmpi slt, %9, %12 : vector<1x128xi32>
    %c0_i32_6 = arith.constant 0 : i32
    %14 = arith.cmpi slt, %7, %c0_i32_6 : i32
    %15 = vector.broadcast %14 : i1 to vector<1x128xi1>
    %16 = vector.broadcast %15 : vector<1x128xi1> to vector<1x128xi1>
    %17 = arith.xori %13, %16 : vector<1x128xi1>
    %18 = arith.andi %17, %11 : vector<1x128xi1>
    %19 = vector.broadcast %7 : i32 to vector<1x128xi32>
    %20 = arith.addi %9, %19 : vector<1x128xi32>
    %21 = arith.select %18, %20, %9 : vector<1x128xi1>, vector<1x128xi32>
    %cst_7 = arith.constant 0.000000e+00 : f32
    %22 = vector.broadcast %cst_7 : f32 to vector<8x128xf32>
    %c-1_i32 = arith.constant -1 : i32
    %23 = vector.broadcast %c-1_i32 : i32 to vector<1x128xi32>
    %24 = arith.addi %21, %23 : vector<1x128xi32>
    %c0_i32_8 = arith.constant 0 : i32
    %25 = vector.broadcast %c0_i32_8 : i32 to vector<1x128xi32>
    %26 = arith.cmpi sge, %24, %25 : vector<1x128xi32>
    %c16_i32_9 = arith.constant 16 : i32
    %27 = vector.broadcast %c16_i32_9 : i32 to vector<1x128xi32>
    %28 = arith.cmpi slt, %24, %27 : vector<1x128xi32>
    %29 = arith.andi %26, %28 : vector<1x128xi1>
    %c1_i32_10 = arith.constant 1 : i32
    %30 = tpu.dynamic_rotate %4 by %c1_i32_10 dim 1 : vector<16x128xf32>, i32 -> vector<16x128xf32>
    %cst_11 = arith.constant 0.000000e+00 : f32
    %31 = vector.shape_cast %29 : vector<1x128xi1> to vector<1x128xi1>
    %32 = vector.broadcast %31 : vector<1x128xi1> to vector<16x128xi1>
    %33 = vector.broadcast %cst_11 : f32 to vector<16x128xf32>
    %34 = arith.select %32, %30, %33 : vector<16x128xi1>, vector<16x128xf32>
    %c0_12 = arith.constant 0 : index
    %c0_13 = arith.constant 0 : index
    %c0_14 = arith.constant 0 : index
    %35 = vector.load %arg3[%c0_12, %c0_13, %c0_14] : memref<3x8x16xf32, #tpu.memory_space<vmem>>, vector<1x8x16xf32>
    %36 = vector.shape_cast %35 : vector<1x8x16xf32> to vector<8x16xf32>
    %cst_15 = arith.constant dense<0.000000e+00> : vector<8x128xf32>
    %37 = tpu.matmul %36, %34, %cst_15 {dimension_numbers = #tpu.dot_dimension_numbers<[1], [0], [0], [1], [0, 0, 1, 1], [], []>} : vector<8x16xf32>, vector<16x128xf32>, vector<8x128xf32> -> vector<8x128xf32>
    %38 = arith.addf %22, %37 : vector<8x128xf32>
    %c1 = arith.constant 1 : index
    %c0_16 = arith.constant 0 : index
    %c0_17 = arith.constant 0 : index
    %39 = vector.load %arg3[%c1, %c0_16, %c0_17] : memref<3x8x16xf32, #tpu.memory_space<vmem>>, vector<1x8x16xf32>
    %40 = vector.shape_cast %39 : vector<1x8x16xf32> to vector<8x16xf32>
    %cst_18 = arith.constant dense<0.000000e+00> : vector<8x128xf32>
    %41 = tpu.matmul %40, %4, %cst_18 {dimension_numbers = #tpu.dot_dimension_numbers<[1], [0], [0], [1], [0, 0, 1, 1], [], []>} : vector<8x16xf32>, vector<16x128xf32>, vector<8x128xf32> -> vector<8x128xf32>
    %42 = arith.addf %38, %41 : vector<8x128xf32>
    %c1_i32_19 = arith.constant 1 : i32
    %43 = vector.broadcast %c1_i32_19 : i32 to vector<1x128xi32>
    %44 = arith.addi %21, %43 : vector<1x128xi32>
    %c0_i32_20 = arith.constant 0 : i32
    %45 = vector.broadcast %c0_i32_20 : i32 to vector<1x128xi32>
    %46 = arith.cmpi sge, %44, %45 : vector<1x128xi32>
    %c16_i32_21 = arith.constant 16 : i32
    %47 = vector.broadcast %c16_i32_21 : i32 to vector<1x128xi32>
    %48 = arith.cmpi slt, %44, %47 : vector<1x128xi32>
    %49 = arith.andi %46, %48 : vector<1x128xi1>
    %c127_i32 = arith.constant 127 : i32
    %50 = tpu.dynamic_rotate %4 by %c127_i32 dim 1 : vector<16x128xf32>, i32 -> vector<16x128xf32>
    %cst_22 = arith.constant 0.000000e+00 : f32
    %51 = vector.shape_cast %49 : vector<1x128xi1> to vector<1x128xi1>
    %52 = vector.broadcast %51 : vector<1x128xi1> to vector<16x128xi1>
    %53 = vector.broadcast %cst_22 : f32 to vector<16x128xf32>
    %54 = arith.select %52, %50, %53 : vector<16x128xi1>, vector<16x128xf32>
    %c2 = arith.constant 2 : index
    %c0_23 = arith.constant 0 : index
    %c0_24 = arith.constant 0 : index
    %55 = vector.load %arg3[%c2, %c0_23, %c0_24] : memref<3x8x16xf32, #tpu.memory_space<vmem>>, vector<1x8x16xf32>
    %56 = vector.shape_cast %55 : vector<1x8x16xf32> to vector<8x16xf32>
    %cst_25 = arith.constant dense<0.000000e+00> : vector<8x128xf32>
    %57 = tpu.matmul %56, %54, %cst_25 {dimension_numbers = #tpu.dot_dimension_numbers<[1], [0], [0], [1], [0, 0, 1, 1], [], []>} : vector<8x16xf32>, vector<16x128xf32>, vector<8x128xf32> -> vector<8x128xf32>
    %58 = arith.addf %42, %57 : vector<8x128xf32>
    %c0_26 = arith.constant 0 : index
    %c0_27 = arith.constant 0 : index
    %59 = vector.load %arg4[%c0_26, %c0_27] : memref<8x128xf32, #tpu.memory_space<vmem>>, vector<8x128xf32>
    tpu.vector_store %arg4[%c0_26, %c0_27], %58 {strides = array<i32>} : memref<8x128xf32, #tpu.memory_space<vmem>>, vector<8x128xf32>,
    return
  }
  func.func @transform_0(%arg0: i32) -> (i32, i32) {
    %c0_i32 = arith.constant 0 : i32
    %c0_i32_0 = arith.constant 0 : i32
    return %c0_i32, %arg0 : i32, i32
  }
  func.func @transform_1(%arg0: i32) -> (i32, i32) {
    %c0_i32 = arith.constant 0 : i32
    %c0_i32_0 = arith.constant 0 : i32
    %c0_i32_1 = arith.constant 0 : i32
    return %c0_i32, %c0_i32_0 : i32, i32
  }
  func.func @transform_2(%arg0: i32) -> (i32, i32, i32) {
    %c0_i32 = arith.constant 0 : i32
    %c0_i32_0 = arith.constant 0 : i32
    %c0_i32_1 = arith.constant 0 : i32
    %c0_i32_2 = arith.constant 0 : i32
    return %c0_i32, %c0_i32_0, %c0_i32_1 : i32, i32, i32
  }
  func.func @transform_3(%arg0: i32) -> (i32, i32) {
    %c0_i32 = arith.constant 0 : i32
    %c0_i32_0 = arith.constant 0 : i32
    return %c0_i32, %arg0 : i32, i32
  }
}

</mosaic_0001>

<bundles_post_ra>
// kernel: tpu_custom_call.1
= control target key start
LH: loop header
LB: loop body
LE: loop exit
PB: predicated region body
PF: predicated region fallthrough
CT: control target
= control target key end

     0   :  { %8 = vsyncpa [#allocation3], 0  ;;  %s546_s0 = inlined_call_operand.hbm [shape: f32[8,128], index: 0, kind: input, shape index: {}]   ;;  %s547_s1 = inlined_call_operand.vmem [shape: f32[16,8], index: 1, kind: input, shape index: {}]   ;;  %s548_s2 = inlined_call_operand.vmem [shape: f32[3,8,16], index: 2, kind: input, shape index: {}]   ;;  %s549_s3 = inlined_call_operand.hbm [shape: f32[8,128], index: 3, kind: output, shape index: {}]  }
   0x1   :  { %9 = vsyncpa [#allocation4], 0  ;;  %s493_s12 = smov [#allocation2]  }
   0x2   :  { %s16_s13 = sshll.u32 %s493_s12, 4  ;;  %s17_s13 = int_to_ptr.vmem [resolvable:$true] %s16_s13 }
   0x3   :  { %s457_s14 = scalar_lea.vmem %s17_s13, 128  ;;  %p462_p1 = scmp.lt.s32.totalorder %s17_s13, %s17_s13 }
   0x4   :  { %p458_p0 = scmp.ne.s32.totalorder %s17_s13, %s457_s14  ;;  %p463_p2 = scmp.lt.s32.totalorder %s457_s14, %s457_s14 }
   0x6   :  { %p464_p3 = por %p463_p2, %p462_p1 }
   0x8   :  { %p465_p4 = pnand %p464_p3, %p458_p0 }
   0xa   :  { %468 = shalt.err (!%p465_p4)
}
   0xb   :  { %19 = dma.hbm_to_vmem [thread:$0]  %s546_s0, 128, %s17_s13, [#allocation3]  }
   0xc   :  { %489 = dma.done.wait [#allocation3], 128  }
   0xd   :  { %490 = vsyncadd [#allocation3], 4294967168  ;;  %vm30_vm0 = vcmask 64512   ;;  %v27_v0 = vld [vmem:[#allocation2] sm:$0xff]  ;;  %v29_v2 = vld [vmem:[%s547_s1 + $0x8] sm:$0xff]  ;;  %v494_v3 = vmov 0.0   ;;  %v114_v9 = vlaneseq }
   0xe   :  { %v28_v1 = vld [vmem:[%s547_s1] sm:$0xff]  ;;  %417 = vmatprep.subr.mxu0 %v27_v0  ;;  %422 = vmatprep.subr.mxu1 %v494_v3  ;;  %vm495_vm1 = vmmov 0   ;;  %s496_s0 = smov 127   ;;  %s497_s21 = smov 1   ;;  %v396_v8 = vld [vmem:[%s548_s2 + $0x8] sm:$0xff]  ;;  %vm143_vm2 = vcmask 130048  }
   0xf   :  { %419 = vmatprep.mubr.msk.f32.mxu0 %vm30_vm0, %v28_v1  ;;  %418 = vmatpush3.msra.mxu0 %v27_v0  ;;  %v115_v10 = vand.u32 127, %v114_v9  ;;  %v140_v16 = vld [vmem:[%s548_s2] sm:$0xff]  ;;  %v401_v17 = vld [vmem:[%s548_s2 + $0x10] sm:$0xff]  ;;  %s498_s27 = smov [#allocation5]  }
  0x10   :  { %420 = vmatmul.mubr.msk.f32.vlgmr.msra.gmra.mxu0 %vm30_vm0, %v29_v2  ;;  %429 = vmatprep.subr.mxu0 %v494_v3  ;;  %s385_s28 = sshll.u32 %s498_s27, 4  ;;  %s386_s28 = int_to_ptr.vmem [resolvable:$true] %s385_s28 }
  0x11   :  { %426 = vmatprep.mubr.msk.f32.mxu1 %vm495_vm1, %v494_v3  ;;  %433 = vmatprep.mubr.msk.f32.mxu0 %vm495_vm1, %v494_v3  ;;  %v120_v11 = vand.u32 15, %v115_v10  ;;  %s469_s2 = scalar_lea.vmem %s386_s28, 128  ;;  %p474_p6 = scmp.lt.s32.totalorder %s386_s28, %s386_s28 }
  0x12   :  { %p470_p5 = scmp.ne.s32.totalorder %s386_s28, %s469_s2  ;;  %p475_p7 = scmp.lt.s32.totalorder %s469_s2, %s469_s2 }
  0x13   :  { %v128_v12 = vadd.s32 4294967295, %v120_v11  ;;  %v290_v13 = vadd.s32 1, %v120_v11 }
  0x14   :  { %p476_p8 = por %p475_p7, %p474_p6 }
  0x15   :  { %vm129_vm3 = vcmp.ge.s32.totalorder %v128_v12, 0  ;;  %vm292_vm4 = vcmp.lt.s32.totalorder %v290_v13, 16 }
  0x16   :  { %p477_p9 = pnand %p476_p8, %p470_p5 }
  0xd0   :  { %v421_v4 = vpop.f32.mrf.mxu0 }
  0xd1   :  { %v113_v5 = vmax.f32 %v421_v4, 0.0 }
  0xd2   :  { %v103_v6 = vpop.f32.mrf.mxu0 }
  0xd3   :  { %v112_v7 = vmax.f32 %v103_v6, 0.0  ;;  %296 = vrot.lane.b32.xlu1 %v113_v5, %s496_s0  ;;  %134 = vrot.lane.b32.xlu0 %v113_v5, %s497_s21 }
  0xd4   :  { %423 = vmatpush3.msra.mxu1 %v113_v5 }
  0xd5   :  { %424 = vmatprep.subr.mxu1 %v494_v3 }
  0xd6   :  { %425 = vmatpush3.msra.mxu1 %v112_v7 }
  0xd7   :  { %294 = vrot.lane.b32.xlu1 %v112_v7, %s496_s0  ;;  %132 = vrot.lane.b32.xlu0 %v112_v7, %s497_s21 }
  0xd8   :  { %436 = vmatprep.subr.mxu1 %v494_v3  ;;  %427 = vmatmul.mubr.msk.f32.vlgmr.msra.gmra.mxu1 %vm143_vm2, %v396_v8 }
  0xd9   :  { %440 = vmatprep.mubr.msk.f32.mxu1 %vm495_vm1, %v494_v3 }
 0x145   :  { %v297_v14 = vpop.permute.xlu1 %296  ;;  %v135_v15 = vpop.permute.xlu0 %134 }
 0x146   :  { %430 = vmatpush3.msk.msra.mxu0 %vm129_vm3, %v135_v15  ;;  %437 = vmatpush3.msk.msra.mxu1 %vm292_vm4, %v297_v14 }
 0x147   :  { %431 = vmatprep.subr.mxu0 %v494_v3  ;;  %438 = vmatprep.subr.mxu1 %v494_v3 }
 0x149   :  { %v295_v18 = vpop.permute.xlu1 %294  ;;  %v133_v19 = vpop.permute.xlu0 %132 }
 0x14a   :  { %432 = vmatpush3.msk.msra.mxu0 %vm129_vm3, %v133_v19  ;;  %439 = vmatpush3.msk.msra.mxu1 %vm292_vm4, %v295_v18 }
 0x14b   :  { %434 = vmatmul.mubr.msk.f32.vlgmr.msra.gmra.mxu0 %vm143_vm2, %v140_v16  ;;  %441 = vmatmul.mubr.msk.f32.vlgmr.msra.gmra.mxu1 %vm143_vm2, %v401_v17 }
 0x198   :  { %v213_v20 = vpop.f32.mrf.mxu1 }
 0x19a   :  { %v428_v21 = vpop.f32.mrf.mxu1 }
 0x20b   :  { %v286_v22 = vpop.f32.mrf.mxu0  ;;  %v373_v23 = vpop.f32.mrf.mxu1 }
 0x20c   :  { %v287_v24 = vadd.f32 %v286_v22, %v213_v20 }
 0x20d   :  { %v435_v25 = vpop.f32.mrf.mxu0  ;;  %v442_v26 = vpop.f32.mrf.mxu1 }
 0x20e   :  { %v377_v27 = vadd.f32 %v373_v23, %v287_v24 }
 0x210   :  { %378 = vst [vmem:[#allocation5] sm:$0xff] %v377_v27 }
 0x211   :  { %480 = shalt.err (!%p477_p9)
}
 0x212   :  { %388 = dma.vmem_to_hbm [thread:$0]  %s386_s28, 128, %s549_s3, [#allocation4]  }
 0x213   :  { %491 = dma.done.wait [#allocation4], 128  }
 0x214   :  { %492 = vsyncadd [#allocation4], 4294967168 }
 0x215   :  { %392 = vsyncpa [#allocation3], 1 }
 0x216   :  { %393 = vsyncpa [#allocation4], 1 }

</bundles_post_ra>
